<compile_context>
chip_gen: v6e
topology: v6e:2x2x1
jax: 0.10.0
libtpu: 0.0.40
codegen_flags: <defaults>
</compile_context>

<pallas_src>
import jax
import jax.numpy as jnp
from jax.experimental import pallas as pl
from jax.experimental.pallas import tpu as pltpu


LANE = 128            # lane width: hidden / logit feature dims padded to this
NEG_MASK = -1e30      # f32 bias for padded logit columns -> exp() == 0 in softmax


def _rup(n, m):
    return ((n + m - 1) // m) * m


def policy_kernel(x_ref, w1_ref, b1_ref, w2_ref, b2_ref, w3_ref, b3_ref, o_ref):
    # Streamed x tile arrives f32 [TB, state_dim]; cast to bf16 for the MXU here
    # (VPU op, hidden under the input DMA).  Weights are bf16, accumulation f32.
    x = x_ref[...].astype(jnp.bfloat16)

    # fc1 + ReLU (activation math in f32 on the VPU, re-cast to bf16 for the MXU)
    h1 = jnp.dot(x, w1_ref[...], preferred_element_type=jnp.float32) + b1_ref[...]
    h1 = jnp.maximum(h1, 0.0).astype(jnp.bfloat16)

    # fc2 + ReLU
    h2 = jnp.dot(h1, w2_ref[...], preferred_element_type=jnp.float32) + b2_ref[...]
    h2 = jnp.maximum(h2, 0.0).astype(jnp.bfloat16)

    # fc3 (padded columns get f32 bias = -1e30, so they vanish in the softmax)
    logits = jnp.dot(h2, w3_ref[...], preferred_element_type=jnp.float32) + b3_ref[...]

    # softmax over the (lane) feature axis in f32; reciprocal on the EUP slot
    m = jnp.max(logits, axis=-1, keepdims=True)
    e = jnp.exp(logits - m)
    denom = jnp.sum(e, axis=-1, keepdims=True)
    probs = e * pl.reciprocal(denom, approx=True)

    # Store only the real action columns, in bf16 -> minimal output HBM stream.
    o_ref[...] = probs[:, : o_ref.shape[-1]].astype(o_ref.dtype)


def policy_forward(x, params, action_dim):
    """x: [B, state_dim] f32.  Returns bf16 probabilities [B, action_dim]."""
    w1, b1, w2, b2, w3, b3 = params
    B, state_dim = x.shape

    # Batch tile: big tiles for large batches (pipeline-overhead amortization),
    # round-up-to-8 fallback for small batches.
    TB = 1024
    if B < TB:
        TB = max(8, _rup(B, 8))
    Bp = _rup(B, TB)
    if Bp != B:
        # Batch-only zero pad (no lane pad, no dtype cast).  Padded rows produce
        # finite probabilities and are sliced off below.
        x = jnp.pad(x, ((0, Bp - B), (0, 0)))
    grid_steps = Bp // TB

    # v7x: with >=2 grid steps, explicitly shard the batch axis across both
    # TensorCores.  Single-step grids (and v5e/v6e) use plain "parallel".
    dim_sem = (pltpu.CORE_PARALLEL,) if grid_steps >= 2 else ("parallel",)

    out = pl.pallas_call(
        policy_kernel,
        out_shape=jax.ShapeDtypeStruct((Bp, action_dim), jnp.bfloat16),
        grid=(grid_steps,),
        in_specs=[
            # x tile streams; last dim == full array dim -> (8,128) rule OK.
            pl.BlockSpec((TB, state_dim), lambda i: (i, 0)),
            # weights / biases stay VMEM-resident (constant block index).
            pl.BlockSpec(w1.shape, lambda i: (0, 0)),
            pl.BlockSpec(b1.shape, lambda i: (0, 0)),
            pl.BlockSpec(w2.shape, lambda i: (0, 0)),
            pl.BlockSpec(b2.shape, lambda i: (0, 0)),
            pl.BlockSpec(w3.shape, lambda i: (0, 0)),
            pl.BlockSpec(b3.shape, lambda i: (0, 0)),
        ],
        # Narrow output: last dim == full array dim (action_dim), bf16.
        out_specs=pl.BlockSpec((TB, action_dim), lambda i: (i, 0)),
        compiler_params=pltpu.CompilerParams(dimension_semantics=dim_sem),
    )(x, w1, b1, w2, b2, w3, b3)

    return out[:B]


def init_params(key, state_dim, action_dim, hidden_dim):
    """nn.Linear-style uniform(-1/sqrt(in), 1/sqrt(in)) init.

    Storage layout (chosen for the kernel):
      w1: [state_dim, HP] bf16   (K dim NOT lane-padded -> x streams un-padded)
      w2: [HP, HP]        bf16
      w3: [HP, AP]        bf16
      b*: [1, out_p]      f32    (fc3 pad columns hold -1e30 -> drop out of softmax)
    Kernel computes x @ W + b, equivalent to PyTorch's x @ W.T + b.
    """
    HP, AP = _rup(hidden_dim, LANE), _rup(action_dim, LANE)
    ks = jax.random.split(key, 6)

    def linear(kw, kb, in_dim, out_dim, in_p, out_p, bias_pad=0.0):
        bound = float(1.0 / (in_dim ** 0.5))
        w = jax.random.uniform(kw, (in_dim, out_dim), jnp.float32, -bound, bound)
        b = jax.random.uniform(kb, (1, out_dim), jnp.float32, -bound, bound)
        wp = jnp.zeros((in_p, out_p), jnp.float32).at[:in_dim, :out_dim].set(w)
        bp = jnp.full((1, out_p), bias_pad, jnp.float32).at[:, :out_dim].set(b)
        return wp.astype(jnp.bfloat16), bp

    w1, b1 = linear(ks[0], ks[1], state_dim, hidden_dim, state_dim, HP)
    w2, b2 = linear(ks[2], ks[3], hidden_dim, hidden_dim, HP, HP)
    w3, b3 = linear(ks[4], ks[5], hidden_dim, action_dim, HP, AP, bias_pad=NEG_MASK)
    return (w1, b1, w2, b2, w3, b3)


def _reference_forward(x, params, state_dim, action_dim, hidden_dim):
    """Pure-JAX f32 reference on the un-padded slices (PyTorch semantics)."""
    w1, b1, w2, b2, w3, b3 = params
    w1 = w1[:state_dim, :hidden_dim].astype(jnp.float32)
    w2 = w2[:hidden_dim, :hidden_dim].astype(jnp.float32)
    w3 = w3[:hidden_dim, :action_dim].astype(jnp.float32)
    b1 = b1[:, :hidden_dim]
    b2 = b2[:, :hidden_dim]
    b3 = b3[:, :action_dim]
    h = jnp.maximum(x @ w1 + b1, 0.0)
    h = jnp.maximum(h @ w2 + b2, 0.0)
    logits = h @ w3 + b3
    return jax.nn.softmax(logits, axis=1)


if __name__ == "__main__":
    state_dim, action_dim, hidden_dim = 16, 8, 32
    batch = 8

    key = jax.random.PRNGKey(0)
    k_x, k_p = jax.random.split(key)
    x = jax.random.normal(k_x, (batch, state_dim), jnp.float32)
    params = init_params(k_p, state_dim, action_dim, hidden_dim)

    out = policy_forward(x, params, action_dim)
    out = jax.block_until_ready(out)

    # sanity: shape, softmax rows sum to ~1 (bf16 output + approx reciprocal),
    # matches the f32 reference to bf16/MXU tolerance.
    assert out.shape == (batch, action_dim)
    out_f32 = out.astype(jnp.float32)
    row_sums = jnp.sum(out_f32, axis=1)
    assert bool(jnp.allclose(row_sums, 1.0, atol=1e-2)), row_sums
    ref = _reference_forward(x, params, state_dim, action_dim, hidden_dim)
    assert bool(jnp.allclose(out_f32, ref, atol=5e-2)), jnp.max(jnp.abs(out_f32 - ref))

    print("KERNEL_OK")
</pallas_src>

<mosaic_0001>
module attributes {stable_mosaic.version = 11 : i64} {
  func.func @policy_kernel(%arg0: i32, %arg1: memref<8x16xf32, #tpu.memory_space<vmem>>, %arg2: memref<16x128xbf16, #tpu.memory_space<vmem>>, %arg3: memref<1x128xf32, #tpu.memory_space<vmem>>, %arg4: memref<128x128xbf16, #tpu.memory_space<vmem>>, %arg5: memref<1x128xf32, #tpu.memory_space<vmem>>, %arg6: memref<128x128xbf16, #tpu.memory_space<vmem>>, %arg7: memref<1x128xf32, #tpu.memory_space<vmem>>, %arg8: memref<8x8xbf16, #tpu.memory_space<vmem>>) attributes {dimension_semantics = [#tpu.dimension_semantics<parallel>], iteration_bounds = array<i64: 1>, scalar_prefetch = 0 : i64, scratch_operands = 0 : i64, tpu.core_type = #tpu.core_type<tc>, window_params = [{transform_indices = @transform_0, window_bounds = array<i64: 8, 16>}, {pipeline_mode = #tpu.pipeline_mode<synchronous>, transform_indices = @transform_1, window_bounds = array<i64: 16, 128>}, {pipeline_mode = #tpu.pipeline_mode<synchronous>, transform_indices = @transform_2, window_bounds = array<i64: 1, 128>}, {pipeline_mode = #tpu.pipeline_mode<synchronous>, transform_indices = @transform_3, window_bounds = array<i64: 128, 128>}, {pipeline_mode = #tpu.pipeline_mode<synchronous>, transform_indices = @transform_4, window_bounds = array<i64: 1, 128>}, {pipeline_mode = #tpu.pipeline_mode<synchronous>, transform_indices = @transform_5, window_bounds = array<i64: 128, 128>}, {pipeline_mode = #tpu.pipeline_mode<synchronous>, transform_indices = @transform_6, window_bounds = array<i64: 1, 128>}, {transform_indices = @transform_7, window_bounds = array<i64: 8, 8>}]} {
    %c0 = arith.constant 0 : index
    %c0_0 = arith.constant 0 : index
    %0 = vector.load %arg1[%c0, %c0_0] : memref<8x16xf32, #tpu.memory_space<vmem>>, vector<8x16xf32>
    %1 = arith.truncf %0 : vector<8x16xf32> to vector<8x16xbf16>
    %c0_1 = arith.constant 0 : index
    %c0_2 = arith.constant 0 : index
    %2 = vector.load %arg2[%c0_1, %c0_2] : memref<16x128xbf16, #tpu.memory_space<vmem>>, vector<16x128xbf16>
    %cst = arith.constant dense<0.000000e+00> : vector<8x128xf32>
    %3 = tpu.matmul %1, %2, %cst {dimension_numbers = #tpu.dot_dimension_numbers<[1], [0], [0], [1], [0, 0, 1, 1], [], []>} : vector<8x16xbf16>, vector<16x128xbf16>, vector<8x128xf32> -> vector<8x128xf32>
    %c0_3 = arith.constant 0 : index
    %c0_4 = arith.constant 0 : index
    %4 = vector.load %arg3[%c0_3, %c0_4] : memref<1x128xf32, #tpu.memory_space<vmem>>, vector<1x128xf32>
    %5 = vector.broadcast %4 : vector<1x128xf32> to vector<8x128xf32>
    %6 = arith.addf %3, %5 : vector<8x128xf32>
    %cst_5 = arith.constant 0.000000e+00 : f32
    %7 = vector.broadcast %cst_5 : f32 to vector<8x128xf32>
    %8 = arith.maximumf %6, %7 : vector<8x128xf32>
    %9 = arith.truncf %8 : vector<8x128xf32> to vector<8x128xbf16>
    %c0_6 = arith.constant 0 : index
    %c0_7 = arith.constant 0 : index
    %10 = vector.load %arg4[%c0_6, %c0_7] : memref<128x128xbf16, #tpu.memory_space<vmem>>, vector<128x128xbf16>
    %cst_8 = arith.constant dense<0.000000e+00> : vector<8x128xf32>
    %11 = tpu.matmul %9, %10, %cst_8 {dimension_numbers = #tpu.dot_dimension_numbers<[1], [0], [0], [1], [0, 0, 1, 1], [], []>} : vector<8x128xbf16>, vector<128x128xbf16>, vector<8x128xf32> -> vector<8x128xf32>
    %c0_9 = arith.constant 0 : index
    %c0_10 = arith.constant 0 : index
    %12 = vector.load %arg5[%c0_9, %c0_10] : memref<1x128xf32, #tpu.memory_space<vmem>>, vector<1x128xf32>
    %13 = vector.broadcast %12 : vector<1x128xf32> to vector<8x128xf32>
    %14 = arith.addf %11, %13 : vector<8x128xf32>
    %cst_11 = arith.constant 0.000000e+00 : f32
    %15 = vector.broadcast %cst_11 : f32 to vector<8x128xf32>
    %16 = arith.maximumf %14, %15 : vector<8x128xf32>
    %17 = arith.truncf %16 : vector<8x128xf32> to vector<8x128xbf16>
    %c0_12 = arith.constant 0 : index
    %c0_13 = arith.constant 0 : index
    %18 = vector.load %arg6[%c0_12, %c0_13] : memref<128x128xbf16, #tpu.memory_space<vmem>>, vector<128x128xbf16>
    %cst_14 = arith.constant dense<0.000000e+00> : vector<8x128xf32>
    %19 = tpu.matmul %17, %18, %cst_14 {dimension_numbers = #tpu.dot_dimension_numbers<[1], [0], [0], [1], [0, 0, 1, 1], [], []>} : vector<8x128xbf16>, vector<128x128xbf16>, vector<8x128xf32> -> vector<8x128xf32>
    %c0_15 = arith.constant 0 : index
    %c0_16 = arith.constant 0 : index
    %20 = vector.load %arg7[%c0_15, %c0_16] : memref<1x128xf32, #tpu.memory_space<vmem>>, vector<1x128xf32>
    %21 = vector.broadcast %20 : vector<1x128xf32> to vector<8x128xf32>
    %22 = arith.addf %19, %21 : vector<8x128xf32>
    %cst_17 = arith.constant dense<0xFF800000> : vector<8xf32>
    %23 = vector.multi_reduction <maximumf>, %22, %cst_17 [1] : vector<8x128xf32> to vector<8xf32>
    %24 = vector.shape_cast %23 : vector<8xf32> to vector<8x1xf32>
    %25 = vector.broadcast %24 : vector<8x1xf32> to vector<8x128xf32>
    %26 = arith.subf %22, %25 : vector<8x128xf32>
    %27 = math.exp %26 : vector<8x128xf32>
    %cst_18 = arith.constant dense<0.000000e+00> : vector<8xf32>
    %28 = vector.multi_reduction <add>, %27, %cst_18 [1] : vector<8x128xf32> to vector<8xf32>
    %29 = vector.shape_cast %28 : vector<8xf32> to vector<8x1xf32>
    %30 = tpu.reciprocal %29 {approx = true} : vector<8x1xf32> -> vector<8x1xf32>
    %31 = vector.broadcast %30 : vector<8x1xf32> to vector<8x128xf32>
    %32 = arith.mulf %27, %31 : vector<8x128xf32>
    %33 = vector.extract_strided_slice %32 {offsets = [0, 0], sizes = [8, 8], strides = [1, 1]} : vector<8x128xf32> to vector<8x8xf32>
    %34 = arith.truncf %33 : vector<8x8xf32> to vector<8x8xbf16>
    %c0_19 = arith.constant 0 : index
    %c0_20 = arith.constant 0 : index
    %35 = vector.load %arg8[%c0_19, %c0_20] : memref<8x8xbf16, #tpu.memory_space<vmem>>, vector<8x8xbf16>
    tpu.vector_store %arg8[%c0_19, %c0_20], %34 {strides = array<i32>} : memref<8x8xbf16, #tpu.memory_space<vmem>>, vector<8x8xbf16>,
    return
  }
  func.func @transform_0(%arg0: i32) -> (i32, i32) {
    %c0_i32 = arith.constant 0 : i32
    %c0_i32_0 = arith.constant 0 : i32
    return %arg0, %c0_i32 : i32, i32
  }
  func.func @transform_1(%arg0: i32) -> (i32, i32) {
    %c0_i32 = arith.constant 0 : i32
    %c0_i32_0 = arith.constant 0 : i32
    %c0_i32_1 = arith.constant 0 : i32
    return %c0_i32, %c0_i32_0 : i32, i32
  }
  func.func @transform_2(%arg0: i32) -> (i32, i32) {
    %c0_i32 = arith.constant 0 : i32
    %c0_i32_0 = arith.constant 0 : i32
    %c0_i32_1 = arith.constant 0 : i32
    return %c0_i32, %c0_i32_0 : i32, i32
  }
  func.func @transform_3(%arg0: i32) -> (i32, i32) {
    %c0_i32 = arith.constant 0 : i32
    %c0_i32_0 = arith.constant 0 : i32
    %c0_i32_1 = arith.constant 0 : i32
    return %c0_i32, %c0_i32_0 : i32, i32
  }
  func.func @transform_4(%arg0: i32) -> (i32, i32) {
    %c0_i32 = arith.constant 0 : i32
    %c0_i32_0 = arith.constant 0 : i32
    %c0_i32_1 = arith.constant 0 : i32
    return %c0_i32, %c0_i32_0 : i32, i32
  }
  func.func @transform_5(%arg0: i32) -> (i32, i32) {
    %c0_i32 = arith.constant 0 : i32
    %c0_i32_0 = arith.constant 0 : i32
    %c0_i32_1 = arith.constant 0 : i32
    return %c0_i32, %c0_i32_0 : i32, i32
  }
  func.func @transform_6(%arg0: i32) -> (i32, i32) {
    %c0_i32 = arith.constant 0 : i32
    %c0_i32_0 = arith.constant 0 : i32
    %c0_i32_1 = arith.constant 0 : i32
    return %c0_i32, %c0_i32_0 : i32, i32
  }
  func.func @transform_7(%arg0: i32) -> (i32, i32) {
    %c0_i32 = arith.constant 0 : i32
    %c0_i32_0 = arith.constant 0 : i32
    return %arg0, %c0_i32 : i32, i32
  }
}

</mosaic_0001>

<bundles_post_ra>
// kernel: tpu_custom_call.1
= control target key start
LH: loop header
LB: loop body
LE: loop exit
PB: predicated region body
PF: predicated region fallthrough
CT: control target
= control target key end

     0   :  { %12 = vsyncpa [#allocation3], 0  ;;  %s724_s0 = inlined_call_operand.hbm [shape: f32[8,16], index: 0, kind: input, shape index: {}]   ;;  %s725_s1 = inlined_call_operand.hbm [shape: bf16[16,128], index: 1, kind: input, shape index: {}]   ;;  %s726_s2 = inlined_call_operand.vmem [shape: f32[1,128], index: 2, kind: input, shape index: {}]   ;;  %s727_s3 = inlined_call_operand.hbm [shape: bf16[128,128], index: 3, kind: input, shape index: {}]   ;;  %s728_s4 = inlined_call_operand.vmem [shape: f32[1,128], index: 4, kind: input, shape index: {}]   ;;  %s729_s5 = inlined_call_operand.hbm [shape: bf16[128,128], index: 5, kind: input, shape index: {}]   ;;  %s730_s6 = inlined_call_operand.vmem [shape: f32[1,128], index: 6, kind: input, shape index: {}]   ;;  %s731_s7 = inlined_call_operand.hbm [shape: bf16[8,8], index: 7, kind: output, shape index: {}]  }
   0x1   :  { %13 = vsyncpa [#allocation6], 0 }
   0x2   :  { %14 = vsyncpa [#allocation9], 0 }
   0x3   :  { %15 = vsyncpa [#allocation4], 0  ;;  %s622_s24 = smov [#allocation5]  }
   0x4   :  { %s31_s25 = sshll.u32 %s622_s24, 4  ;;  %s32_s25 = int_to_ptr.vmem [resolvable:$true] %s31_s25 }
   0x5   :  { %s522_s26 = scalar_lea.vmem %s32_s25, 128  ;;  %p527_p1 = scmp.lt.s32.totalorder %s32_s25, %s32_s25 }
   0x6   :  { %p523_p0 = scmp.ne.s32.totalorder %s32_s25, %s522_s26  ;;  %p528_p2 = scmp.lt.s32.totalorder %s522_s26, %s522_s26 }
   0x8   :  { %p529_p3 = por %p528_p2, %p527_p1 }
   0xa   :  { %p530_p4 = pnand %p529_p3, %p523_p0 }
   0xc   :  { %533 = shalt.err (!%p530_p4)
}
   0xd   :  { %s623_s27 = smov 64   ;;  %s624_s28 = smov 4  }
   0xe   :  { %37 = dma.hbm_to_vmem [thread:$0]  %s725_s1, 128, %s32_s25, [#allocation6], %s623_s27, %s623_s27, %s624_s28  }
   0xf   :  { %s625_s8 = smov [#allocation2]   ;;  %s626_s10 = smov [#allocation7]  }
  0x10   :  { %s22_s9 = sshll.u32 %s625_s8, 4  ;;  %s45_s11 = sshll.u32 %s626_s10, 4  ;;  %s23_s9 = int_to_ptr.vmem [resolvable:$true] %s22_s9  ;;  %s46_s11 = int_to_ptr.vmem [resolvable:$true] %s45_s11 }
  0x11   :  { %s542_s12 = scalar_lea.vmem %s23_s9, 128  ;;  %p547_p6 = scmp.lt.s32.totalorder %s23_s9, %s23_s9 }
  0x12   :  { %p543_p5 = scmp.ne.s32.totalorder %s23_s9, %s542_s12  ;;  %p548_p7 = scmp.lt.s32.totalorder %s542_s12, %s542_s12 }
  0x14   :  { %p549_p8 = por %p548_p7, %p547_p6 }
  0x16   :  { %p550_p9 = pnand %p549_p8, %p543_p5 }
  0x18   :  { %553 = shalt.err (!%p550_p9)
}
  0x19   :  { %25 = dma.hbm_to_vmem [thread:$0]  %s724_s0, 128, %s23_s9, [#allocation3]  }
  0x1a   :  { %s562_s15 = scalar_lea.vmem %s46_s11, 1024  ;;  %p567_p11 = scmp.lt.s32.totalorder %s46_s11, %s46_s11 }
  0x1b   :  { %p563_p10 = scmp.ne.s32.totalorder %s46_s11, %s562_s15  ;;  %p568_p12 = scmp.lt.s32.totalorder %s562_s15, %s562_s15 }
  0x1d   :  { %p569_p13 = por %p568_p12, %p567_p11 }
  0x1f   :  { %p570_p0 = pnand %p569_p13, %p563_p10 }
  0x21   :  { %573 = shalt.err (!%p570_p0)
}
  0x22   :  { %51 = dma.hbm_to_vmem [thread:$0]  %s727_s3, 1024, %s46_s11, [#allocation6], %s623_s27, %s623_s27, %s624_s28  }
  0x23   :  { %s627_s17 = smov [#allocation8]  }
  0x24   :  { %s59_s18 = sshll.u32 %s627_s17, 4  ;;  %s60_s18 = int_to_ptr.vmem [resolvable:$true] %s59_s18 }
  0x25   :  { %s582_s19 = scalar_lea.vmem %s60_s18, 1024  ;;  %p587_p2 = scmp.lt.s32.totalorder %s60_s18, %s60_s18 }
  0x26   :  { %p583_p1 = scmp.ne.s32.totalorder %s60_s18, %s582_s19  ;;  %p588_p3 = scmp.lt.s32.totalorder %s582_s19, %s582_s19 }
  0x28   :  { %p589_p4 = por %p588_p3, %p587_p2 }
  0x2a   :  { %p590_p5 = pnand %p589_p4, %p583_p1 }
  0x2c   :  { %593 = shalt.err (!%p590_p5)
}
  0x2d   :  { %65 = dma.hbm_to_vmem [thread:$0]  %s729_s5, 1024, %s60_s18, [#allocation9], %s623_s27, %s623_s27, %s624_s28  }
  0x2e   :  { %614 = dma.done.wait [#allocation3], 128  }
  0x2f   :  { %615 = vsyncadd [#allocation3], 4294967168 }
  0x30   :  { %616 = dma.done.wait [#allocation6], 1152  }
  0x31   :  { %617 = vsyncadd [#allocation6], 4294966144 }
  0x32   :  { %618 = dma.done.wait [#allocation9], 1024  }
  0x33   :  { %619 = vsyncadd [#allocation9], 4294966272  ;;  %v628_v0 = vmov 0.0   ;;  %vm629_vm0 = vmmov 0   ;;  %v493_v1 = vld [vmem:[#allocation5] sm:$0xff]   ;;  %v81_v2 = vld [vmem:[#allocation2] sm:$0xff] }
  0x34   :  { %438 = vmatprep.subr.bf16.mxu0 %v628_v0  ;;  %440 = vmatprep.mubr.msk.bf16.mxu0 %vm629_vm0, %v628_v0  ;;  %v82_v3 = vpack.c.bf16 %v81_v2, %v81_v2  ;;  %vm98_vm1 = vcmask 130048   ;;  %v494_v4 = vld [vmem:[#allocation7 + $0x38] sm:$0xff]   ;;  %v495_v5 = vld [vmem:[#allocation7 + $0x30] sm:$0xff]   ;;  %v496_v6 = vld [vmem:[#allocation7 + $0x28] sm:$0xff]   ;;  %vm378_vm2 = vcmask 60416  }
  0x35   :  { %444 = vmatprep.subr.bf16.mxu1 %v628_v0  ;;  %460 = vmatprep.mubr.msk.bf16.mxu1 %vm629_vm0, %v628_v0  ;;  %v497_v7 = vld [vmem:[#allocation7 + $0x20] sm:$0xff]   ;;  %v498_v8 = vld [vmem:[#allocation7 + $0x18] sm:$0xff]   ;;  %v499_v9 = vld [vmem:[#allocation7 + $0x10] sm:$0xff]  }
  0x36   :  { %439 = vmatpush3.bf16.msra.mxu0 %v493_v1  ;;  %445 = vmatpush3.bf16.msra.mxu1 %v494_v4  ;;  %v500_v10 = vld [vmem:[#allocation7 + $0x8] sm:$0xff]   ;;  %v501_v11 = vld [vmem:[#allocation7] sm:$0xff]   ;;  %v502_v12 = vld [vmem:[#allocation8 + $0x38] sm:$0xff]  }
  0x37   :  { %464 = vmatprep.subr.bf16.mxu0 %v628_v0  ;;  %446 = vmatprep.subr.bf16.mxu1 %v628_v0  ;;  %v503_v13 = vld [vmem:[#allocation8 + $0x30] sm:$0xff]   ;;  %v504_v14 = vld [vmem:[#allocation8 + $0x28] sm:$0xff]   ;;  %v505_v15 = vld [vmem:[#allocation8 + $0x20] sm:$0xff]  }
  0x38   :  { %v506_v16 = vld [vmem:[#allocation8 + $0x18] sm:$0xff]   ;;  %v507_v17 = vld [vmem:[#allocation8 + $0x10] sm:$0xff]   ;;  %v508_v26 = vld [vmem:[#allocation8 + $0x8] sm:$0xff]  }
  0x39   :  { %441 = vmatmul.mubr.msk.bf16.vlgmr.msra.gmra.mxu0 %vm98_vm1, %v82_v3  ;;  %v397_v18 = vld [vmem:[%s726_s2] ss:$0 sm:$0xff]  ;;  %v509_v27 = vld [vmem:[#allocation8] sm:$0xff]  }
  0x3a   :  { %480 = vmatprep.mubr.msk.bf16.mxu0 %vm629_vm0, %v628_v0  ;;  %447 = vmatpush3.bf16.msra.mxu1 %v495_v5  ;;  %v400_v28 = vld [vmem:[%s728_s4] ss:$0 sm:$0xff]  ;;  %s630_s4 = smov [#allocation10]  }
  0x3b   :  { %448 = vmatprep.subr.bf16.mxu1 %v628_v0  ;;  %465 = vmatpush3.bf16.msra.mxu0 %v502_v12  ;;  %v409_v36 = vld [vmem:[%s730_s6] ss:$0 sm:$0xff]  ;;  %s386_s24 = sshll.u32 %s630_s4, 4  ;;  %s387_s24 = int_to_ptr.vmem [resolvable:$true] %s386_s24 }
  0x3c   :  { %466 = vmatprep.subr.bf16.mxu0 %v628_v0  ;;  %s594_s6 = scalar_lea.vmem %s387_s24, 64  ;;  %p599_p7 = scmp.lt.s32.totalorder %s387_s24, %s387_s24 }
  0x3d   :  { %p595_p6 = scmp.ne.s32.totalorder %s387_s24, %s594_s6  ;;  %p600_p8 = scmp.lt.s32.totalorder %s594_s6, %s594_s6 }
  0x3e   :  { %449 = vmatpush3.bf16.msra.mxu1 %v496_v6 }
  0x3f   :  { %450 = vmatprep.subr.bf16.mxu1 %v628_v0  ;;  %467 = vmatpush3.bf16.msra.mxu0 %v503_v13  ;;  %p601_p9 = por %p600_p8, %p599_p7 }
  0x40   :  { %468 = vmatprep.subr.bf16.mxu0 %v628_v0 }
  0x41   :  { %p602_p10 = pnand %p601_p9, %p595_p6 }
  0x42   :  { %451 = vmatpush3.bf16.msra.mxu1 %v497_v7 }
  0x43   :  { %452 = vmatprep.subr.bf16.mxu1 %v628_v0  ;;  %469 = vmatpush3.bf16.msra.mxu0 %v504_v14 }
  0x44   :  { %470 = vmatprep.subr.bf16.mxu0 %v628_v0 }
  0x46   :  { %453 = vmatpush3.bf16.msra.mxu1 %v498_v8 }
  0x47   :  { %454 = vmatprep.subr.bf16.mxu1 %v628_v0  ;;  %471 = vmatpush3.bf16.msra.mxu0 %v505_v15 }
  0x48   :  { %472 = vmatprep.subr.bf16.mxu0 %v628_v0 }
  0x4a   :  { %455 = vmatpush3.bf16.msra.mxu1 %v499_v9 }
  0x4b   :  { %456 = vmatprep.subr.bf16.mxu1 %v628_v0  ;;  %473 = vmatpush3.bf16.msra.mxu0 %v506_v16 }
  0x4c   :  { %474 = vmatprep.subr.bf16.mxu0 %v628_v0 }
  0x4e   :  { %457 = vmatpush3.bf16.msra.mxu1 %v500_v10 }
  0x4f   :  { %458 = vmatprep.subr.bf16.mxu1 %v628_v0  ;;  %475 = vmatpush3.bf16.msra.mxu0 %v507_v17 }
  0x50   :  { %476 = vmatprep.subr.bf16.mxu0 %v628_v0 }
  0x52   :  { %459 = vmatpush3.bf16.msra.mxu1 %v501_v11 }
  0x53   :  { %477 = vmatpush3.bf16.msra.mxu0 %v508_v26 }
  0x54   :  { %478 = vmatprep.subr.bf16.mxu0 %v628_v0 }
  0x57   :  { %479 = vmatpush3.bf16.msra.mxu0 %v509_v27 }
  0xf9   :  { %v136_v19 = vpop.f32.mrf.mxu0 }
  0xfa   :  { %v137_v20 = vadd.f32 %v397_v18, %v136_v19 }
  0xfb   :  { %v442_v21 = vpop.f32.mrf.mxu0 }
  0xfc   :  { %v142_v22 = vmax.f32 %v137_v20, 0.0 }
  0xfd   :  { %v139_v23 = vpop.f32.mrf.mxu0 }
  0xfe   :  { %v143_v24 = vpack.c.bf16 %v142_v22, %v142_v22 }
  0xff   :  { %v443_v25 = vpop.f32.mrf.mxu0 }
 0x100   :  { %461 = vmatmul.mubr.bf16.vlgmr.msra.gmra.mxu1 %v143_v24 }
 0x1c0   :  { %v249_v29 = vpop.f32.mrf.mxu1 }
 0x1c1   :  { %v250_v30 = vadd.f32 %v400_v28, %v249_v29 }
 0x1c2   :  { %v462_v31 = vpop.f32.mrf.mxu1 }
 0x1c3   :  { %v255_v32 = vmax.f32 %v250_v30, 0.0 }
 0x1c4   :  { %v252_v33 = vpop.f32.mrf.mxu1 }
 0x1c5   :  { %v256_v34 = vpack.c.bf16 %v255_v32, %v255_v32 }
 0x1c6   :  { %v463_v35 = vpop.f32.mrf.mxu1 }
 0x1c7   :  { %481 = vmatmul.mubr.bf16.vlgmr.msra.gmra.mxu0 %v256_v34 }
 0x287   :  { %v362_v37 = vpop.f32.mrf.mxu0 }
 0x288   :  { %v363_v38 = vadd.f32 %v409_v36, %v362_v37 }
 0x289   :  { %v482_v39 = vpop.f32.mrf.mxu0 }
 0x28a   :  { %368 = vmax.xlane.f32.xlu0 %v363_v38 }
 0x28b   :  { %v365_v40 = vpop.f32.mrf.mxu0 }
 0x28d   :  { %v483_v41 = vpop.f32.mrf.mxu0 }
 0x313   :  { %v369_v42 = vpop.xlane.xlu0 %368 }
 0x314   :  { %v370_v43 = vsub.f32 %v363_v38, %v369_v42 }
 0x316   :  { %v371_v44 = vmul.f32 1.442695, %v370_v43 }
 0x318   :  { %510 = vpow2.f32 %v371_v44 }
 0x325   :  { %v511_v45 = vpop.eup %510 }
 0x326   :  { %373 = vadd.xlane.f32.xlu0 %v511_v45 }
 0x3af   :  { %v374_v46 = vpop.xlane.xlu0 %373 }
 0x3b0   :  { %512 = vrcp.f32 %v374_v46 }
 0x3bd   :  { %v513_v47 = vpop.eup %512 }
 0x3be   :  { %v376_v48 = vmul.f32 %v513_v47, %v511_v45 }
 0x3c0   :  { %v377_v49 = vpack.c.bf16 %v376_v48, %v376_v48 }
 0x3c2   :  { %379 = vst.msk [vmem:[#allocation10] sm:$0xf] %vm378_vm2, %v377_v49 }
 0x3c3   :  { %605 = shalt.err (!%p602_p10)
}
 0x3c4   :  { %389 = dma.vmem_to_hbm [thread:$0]  %s387_s24, 64, %s731_s7, [#allocation4]  }
 0x3c5   :  { %620 = dma.done.wait [#allocation4], 64  }
 0x3c6   :  { %621 = vsyncadd [#allocation4], 4294967232 }
 0x3c7   :  { %393 = vsyncpa [#allocation3], 1 }
 0x3c8   :  { %394 = vsyncpa [#allocation6], 1 }
 0x3c9   :  { %395 = vsyncpa [#allocation9], 1 }
 0x3ca   :  { %396 = vsyncpa [#allocation4], 1 }

</bundles_post_ra>
